<compile_context>
chip_gen: v5e
topology: v5e:2x2
jax: 0.10.0
libtpu: 0.0.40
codegen_flags: <defaults>
</compile_context>

<pallas_src>
import math

import jax
import jax.numpy as jnp
from jax.experimental import pallas as pl
from jax.experimental.pallas import tpu as pltpu


def _round_up(x, m):
    return ((x + m - 1) // m) * m


def _pack_class_axis(a):
    """(..., C) -> (..., C_pad//128, 128), zero-padded on the class axis."""
    C = a.shape[-1]
    C_pad = _round_up(max(C, 1), 128)
    if C_pad != C:
        pad = [(0, 0)] * (a.ndim - 1) + [(0, C_pad - C)]
        a = jnp.pad(a, pad)
    return a.reshape(a.shape[:-1] + (C_pad // 128, 128))


def pack_sparse_linear_params(emb, bias=None):
    """One-time (init-time) repack of the SparseLinear parameters.

    emb:  (F, C) float array   -> (F, C_pad//128, 128) float32
    bias: (C,) float or None   -> (1, C_pad//128, 128) float32 or None
    """
    emb_packed = _pack_class_axis(emb.astype(jnp.float32))
    bias_packed = (None if bias is None
                   else _pack_class_axis(bias.astype(jnp.float32)[None, :]))
    return emb_packed, bias_packed


def _choose_c_tile_sublanes(S, R, budget_bytes):
    """Largest legal class tile (in 128-lane sublane groups) under budget."""
    # Gathered rows are double-buffered by the auto-pipeline: 2 * R tiles live.
    if 2 * R * S * 128 * 4 <= budget_bytes:
        return S                      # full row, no redundant re-gathers
    fitting = [t for t in range(8, S, 8)
               if S % t == 0 and 2 * R * t * 128 * 4 <= budget_bytes]
    return max(fitting) if fitting else S


def _emb_index_map(r, R, L_pad):
    def imap(b, c, l, x_sm):
        # Data-dependent gather: row (block) index read from SMEM.
        return (x_sm[b * L_pad + l * R + r], c, 0)
    return imap


def _make_kernel(R, L_pad, has_bias):
    def kernel(x_sm, w_sm, *refs):
        # x_sm is consumed only by the index_maps (do NOT delete/re-reference).
        del x_sm
        emb_refs = refs[:R]
        if has_bias:
            bias_ref = refs[R]
            out_ref = refs[R + 1]
        else:
            out_ref = refs[R]

        b = pl.program_id(0)
        l = pl.program_id(2)

        @pl.when(l == 0)
        def _init():
            # Fold bias into the accumulator init (no separate finalize pass).
            if has_bias:
                out_ref[...] = bias_ref[...]
            else:
                out_ref[...] = jnp.zeros_like(out_ref)

        acc = out_ref[...]
        base = b * L_pad + l * R
        for r in range(R):                       # static unroll: R adds/step
            acc = acc + w_sm[base + r] * emb_refs[r][...]
        out_ref[...] = acc

    return kernel


def sparse_linear_packed(x, w, emb_packed, bias_packed=None, *,
                         num_classes=None, rows_per_step=8,
                         vmem_budget_bytes=16 * 1024 * 1024):
    """Pallas-backed SparseLinear.forward on a pre-packed table.

    x:           (B, L) int feature indices
    w:           (B, L) float feature weights
    emb_packed:  (F, S, 128) float32, from pack_sparse_linear_params
    bias_packed: (1, S, 128) float32 or None
    returns      (B, num_classes) float32
    """
    B, L = x.shape
    F, S, lanes = emb_packed.shape
    assert lanes == 128
    C_pad = S * 128
    C = C_pad if num_classes is None else num_classes

    # Amortize per-grid-step overhead: R gathered rows per step.
    R = max(1, min(rows_per_step, L))
    L_pad = _round_up(L, R)
    num_l_steps = L_pad // R

    # Class tile = whole row unless VMEM budget forces a split.
    c_tile_s = _choose_c_tile_sublanes(S, R, vmem_budget_bytes)
    num_c_tiles = S // c_tile_s

    # Clip indices so a garbage index can never trigger an OOB row DMA
    # (valid inputs unchanged; invalid ones are UB in PyTorch anyway).
    x_i = jnp.clip(x.astype(jnp.int32), 0, F - 1)
    w_f = w.astype(jnp.float32)
    if L_pad != L:
        # Padded positions: index 0 (any valid row) with weight 0 -> no-op.
        x_i = jnp.pad(x_i, ((0, 0), (0, L_pad - L)))
        w_f = jnp.pad(w_f, ((0, 0), (0, L_pad - L)))
    x_flat = x_i.reshape(-1)
    w_flat = w_f.reshape(-1)
    # TODO(synk): x/w currently live fully in SMEM; for very large B*L stream
    # w through per-batch VMEM blocks instead to avoid SMEM capacity limits.

    has_bias = bias_packed is not None
    kernel = _make_kernel(R, L_pad, has_bias)

    w_spec = pl.BlockSpec(memory_space=pltpu.MemorySpace.SMEM)
    emb_specs = [pl.BlockSpec((1, c_tile_s, 128), _emb_index_map(r, R, L_pad))
                 for r in range(R)]
    out_spec = pl.BlockSpec((1, c_tile_s, 128),
                            lambda b, c, l, x_sm: (b, c, 0))

    in_specs = [w_spec] + emb_specs
    operands = [x_flat, w_flat] + [emb_packed] * R
    if has_bias:
        in_specs.append(pl.BlockSpec((1, c_tile_s, 128),
                                     lambda b, c, l, x_sm: (0, c, 0)))
        operands.append(bias_packed)

    out = pl.pallas_call(
        kernel,
        out_shape=jax.ShapeDtypeStruct((B, S, 128), jnp.float32),
        grid_spec=pltpu.PrefetchScalarGridSpec(
            num_scalar_prefetch=1,
            grid=(B, num_c_tiles, num_l_steps),
            in_specs=in_specs,
            out_specs=out_spec,
        ),
        compiler_params=pltpu.CompilerParams(
            dimension_semantics=("parallel", "parallel", "arbitrary"),
            vmem_limit_bytes=32 * 1024 * 1024,  # small tiles; fits v5e..v7x
        ),
    )(*operands)

    return out.reshape(B, C_pad)[:, :C]


def sparse_linear(x, w, emb, bias=None):
    """Convenience wrapper taking the raw (F, C) table.

    NOTE: packs the table per call; in real use call
    pack_sparse_linear_params once at init and use sparse_linear_packed.
    """
    emb_packed, bias_packed = pack_sparse_linear_params(emb, bias)
    return sparse_linear_packed(x, w, emb_packed, bias_packed,
                                num_classes=emb.shape[-1])


def init_sparse_linear_params(key, num_features, num_classes, bias=False,
                              padding_idx=0):
    """Deterministic re-implementation of SparseLinear.reset_parameters()."""
    stdv = 1.0 / math.sqrt(num_features)
    k_w, k_b = jax.random.split(key)
    weight = jax.random.uniform(
        k_w, (num_features, num_classes), jnp.float32,
        minval=-stdv, maxval=stdv)
    if padding_idx is not None:
        weight = weight.at[padding_idx].set(0.0)
    if bias:
        b = jax.random.uniform(
            k_b, (num_classes,), jnp.float32, minval=-stdv, maxval=stdv)
    else:
        b = None
    return weight, b


if __name__ == "__main__":
    # Small synthetic shapes: batch=2, seq length=8, features=32, classes=16.
    batch, length = 2, 8
    num_features, num_classes = 32, 16
    padding_idx = 0

    key = jax.random.PRNGKey(0)
    k_emb, k_x, k_w = jax.random.split(key, 3)

    emb, bias = init_sparse_linear_params(
        k_emb, num_features, num_classes, bias=True, padding_idx=padding_idx)

    # Feature indices (include some padding_idx entries) and feature weights.
    x = jax.random.randint(k_x, (batch, length), 0, num_features, jnp.int32)
    x = x.at[0, 0].set(padding_idx)
    x = x.at[1, 3].set(padding_idx)
    w = jax.random.normal(k_w, (batch, length), jnp.float32)

    # Pure-JAX reference of the PyTorch forward.
    ref = jnp.sum(w[:, :, None] * jnp.take(emb, x, axis=0), axis=1)

    # Pack the table ONCE (init-time), then call the forward twice.
    emb_packed, bias_packed = pack_sparse_linear_params(emb, bias)

    out_nobias = jax.block_until_ready(
        sparse_linear_packed(x, w, emb_packed, None, num_classes=num_classes))
    out_bias = jax.block_until_ready(
        sparse_linear_packed(x, w, emb_packed, bias_packed,
                             num_classes=num_classes))

    assert out_nobias.shape == (batch, num_classes)
    assert out_bias.shape == (batch, num_classes)
    assert jnp.allclose(out_nobias, ref, atol=1e-5, rtol=1e-5)
    assert jnp.allclose(out_bias, ref + bias, atol=1e-5, rtol=1e-5)

    print("KERNEL_OK")
</pallas_src>

<mosaic_0001>
module attributes {stable_mosaic.version = 11 : i64} {
  func.func @kernel(%arg0: i32, %arg1: i32, %arg2: i32, %arg3: memref<16xi32, #tpu.memory_space<smem>>, %arg4: memref<16xf32, #tpu.memory_space<smem>>, %arg5: memref<1x1x128xf32, #tpu.memory_space<vmem>>, %arg6: memref<1x1x128xf32, #tpu.memory_space<vmem>>, %arg7: memref<1x1x128xf32, #tpu.memory_space<vmem>>, %arg8: memref<1x1x128xf32, #tpu.memory_space<vmem>>, %arg9: memref<1x1x128xf32, #tpu.memory_space<vmem>>, %arg10: memref<1x1x128xf32, #tpu.memory_space<vmem>>, %arg11: memref<1x1x128xf32, #tpu.memory_space<vmem>>, %arg12: memref<1x1x128xf32, #tpu.memory_space<vmem>>, %arg13: memref<1x1x128xf32, #tpu.memory_space<vmem>>) attributes {dimension_semantics = [#tpu.dimension_semantics<parallel>, #tpu.dimension_semantics<parallel>, #tpu.dimension_semantics<arbitrary>], iteration_bounds = array<i64: 2, 1, 1>, scalar_prefetch = 1 : i64, scratch_operands = 0 : i64, tpu.core_type = #tpu.core_type<tc>, window_params = [{transform_indices = @transform_0, window_bounds = array<i64: 16>}, {transform_indices = @transform_1, window_bounds = array<i64: 1, 1, 128>}, {transform_indices = @transform_2, window_bounds = array<i64: 1, 1, 128>}, {transform_indices = @transform_3, window_bounds = array<i64: 1, 1, 128>}, {transform_indices = @transform_4, window_bounds = array<i64: 1, 1, 128>}, {transform_indices = @transform_5, window_bounds = array<i64: 1, 1, 128>}, {transform_indices = @transform_6, window_bounds = array<i64: 1, 1, 128>}, {transform_indices = @transform_7, window_bounds = array<i64: 1, 1, 128>}, {transform_indices = @transform_8, window_bounds = array<i64: 1, 1, 128>}, {transform_indices = @transform_9, window_bounds = array<i64: 1, 1, 128>}]} {
    %c0_i32 = arith.constant 0 : i32
    %0 = arith.cmpi eq, %arg2, %c0_i32 : i32
    %1 = arith.extui %0 : i1 to i32
    %c0_i32_0 = arith.constant 0 : i32
    %2 = arith.cmpi ne, %1, %c0_i32_0 : i32
    scf.if %2 {
      %cst = arith.constant 0.000000e+00 : f32
      %64 = vector.broadcast %cst : f32 to vector<1x1x128xf32>
      %c0_32 = arith.constant 0 : index
      %c0_33 = arith.constant 0 : index
      %c0_34 = arith.constant 0 : index
      %65 = vector.load %arg13[%c0_32, %c0_33, %c0_34] : memref<1x1x128xf32, #tpu.memory_space<vmem>>, vector<1x1x128xf32>
      tpu.vector_store %arg13[%c0_32, %c0_33, %c0_34], %64 {strides = array<i32>} : memref<1x1x128xf32, #tpu.memory_space<vmem>>, vector<1x1x128xf32>,
    } else {
    }
    %c0 = arith.constant 0 : index
    %c0_1 = arith.constant 0 : index
    %c0_2 = arith.constant 0 : index
    %3 = vector.load %arg13[%c0, %c0_1, %c0_2] : memref<1x1x128xf32, #tpu.memory_space<vmem>>, vector<1x1x128xf32>
    %c8_i32 = arith.constant 8 : i32
    %4 = arith.muli %arg0, %c8_i32 : i32
    %c8_i32_3 = arith.constant 8 : i32
    %5 = arith.muli %arg2, %c8_i32_3 : i32
    %6 = arith.addi %4, %5 : i32
    %c0_i32_4 = arith.constant 0 : i32
    %7 = arith.addi %6, %c0_i32_4 : i32
    %8 = arith.index_cast %7 : i32 to index
    %9 = memref.load %arg4[%8] : memref<16xf32, #tpu.memory_space<smem>>
    %c0_5 = arith.constant 0 : index
    %c0_6 = arith.constant 0 : index
    %c0_7 = arith.constant 0 : index
    %10 = vector.load %arg5[%c0_5, %c0_6, %c0_7] : memref<1x1x128xf32, #tpu.memory_space<vmem>>, vector<1x1x128xf32>
    %11 = vector.broadcast %9 : f32 to vector<1x1x128xf32>
    %12 = arith.mulf %11, %10 : vector<1x1x128xf32>
    %13 = arith.addf %3, %12 : vector<1x1x128xf32>
    %c1_i32 = arith.constant 1 : i32
    %14 = arith.addi %6, %c1_i32 : i32
    %15 = arith.index_cast %14 : i32 to index
    %16 = memref.load %arg4[%15] : memref<16xf32, #tpu.memory_space<smem>>
    %c0_8 = arith.constant 0 : index
    %c0_9 = arith.constant 0 : index
    %c0_10 = arith.constant 0 : index
    %17 = vector.load %arg6[%c0_8, %c0_9, %c0_10] : memref<1x1x128xf32, #tpu.memory_space<vmem>>, vector<1x1x128xf32>
    %18 = vector.broadcast %16 : f32 to vector<1x1x128xf32>
    %19 = arith.mulf %18, %17 : vector<1x1x128xf32>
    %20 = arith.addf %13, %19 : vector<1x1x128xf32>
    %c2_i32 = arith.constant 2 : i32
    %21 = arith.addi %6, %c2_i32 : i32
    %22 = arith.index_cast %21 : i32 to index
    %23 = memref.load %arg4[%22] : memref<16xf32, #tpu.memory_space<smem>>
    %c0_11 = arith.constant 0 : index
    %c0_12 = arith.constant 0 : index
    %c0_13 = arith.constant 0 : index
    %24 = vector.load %arg7[%c0_11, %c0_12, %c0_13] : memref<1x1x128xf32, #tpu.memory_space<vmem>>, vector<1x1x128xf32>
    %25 = vector.broadcast %23 : f32 to vector<1x1x128xf32>
    %26 = arith.mulf %25, %24 : vector<1x1x128xf32>
    %27 = arith.addf %20, %26 : vector<1x1x128xf32>
    %c3_i32 = arith.constant 3 : i32
    %28 = arith.addi %6, %c3_i32 : i32
    %29 = arith.index_cast %28 : i32 to index
    %30 = memref.load %arg4[%29] : memref<16xf32, #tpu.memory_space<smem>>
    %c0_14 = arith.constant 0 : index
    %c0_15 = arith.constant 0 : index
    %c0_16 = arith.constant 0 : index
    %31 = vector.load %arg8[%c0_14, %c0_15, %c0_16] : memref<1x1x128xf32, #tpu.memory_space<vmem>>, vector<1x1x128xf32>
    %32 = vector.broadcast %30 : f32 to vector<1x1x128xf32>
    %33 = arith.mulf %32, %31 : vector<1x1x128xf32>
    %34 = arith.addf %27, %33 : vector<1x1x128xf32>
    %c4_i32 = arith.constant 4 : i32
    %35 = arith.addi %6, %c4_i32 : i32
    %36 = arith.index_cast %35 : i32 to index
    %37 = memref.load %arg4[%36] : memref<16xf32, #tpu.memory_space<smem>>
    %c0_17 = arith.constant 0 : index
    %c0_18 = arith.constant 0 : index
    %c0_19 = arith.constant 0 : index
    %38 = vector.load %arg9[%c0_17, %c0_18, %c0_19] : memref<1x1x128xf32, #tpu.memory_space<vmem>>, vector<1x1x128xf32>
    %39 = vector.broadcast %37 : f32 to vector<1x1x128xf32>
    %40 = arith.mulf %39, %38 : vector<1x1x128xf32>
    %41 = arith.addf %34, %40 : vector<1x1x128xf32>
    %c5_i32 = arith.constant 5 : i32
    %42 = arith.addi %6, %c5_i32 : i32
    %43 = arith.index_cast %42 : i32 to index
    %44 = memref.load %arg4[%43] : memref<16xf32, #tpu.memory_space<smem>>
    %c0_20 = arith.constant 0 : index
    %c0_21 = arith.constant 0 : index
    %c0_22 = arith.constant 0 : index
    %45 = vector.load %arg10[%c0_20, %c0_21, %c0_22] : memref<1x1x128xf32, #tpu.memory_space<vmem>>, vector<1x1x128xf32>
    %46 = vector.broadcast %44 : f32 to vector<1x1x128xf32>
    %47 = arith.mulf %46, %45 : vector<1x1x128xf32>
    %48 = arith.addf %41, %47 : vector<1x1x128xf32>
    %c6_i32 = arith.constant 6 : i32
    %49 = arith.addi %6, %c6_i32 : i32
    %50 = arith.index_cast %49 : i32 to index
    %51 = memref.load %arg4[%50] : memref<16xf32, #tpu.memory_space<smem>>
    %c0_23 = arith.constant 0 : index
    %c0_24 = arith.constant 0 : index
    %c0_25 = arith.constant 0 : index
    %52 = vector.load %arg11[%c0_23, %c0_24, %c0_25] : memref<1x1x128xf32, #tpu.memory_space<vmem>>, vector<1x1x128xf32>
    %53 = vector.broadcast %51 : f32 to vector<1x1x128xf32>
    %54 = arith.mulf %53, %52 : vector<1x1x128xf32>
    %55 = arith.addf %48, %54 : vector<1x1x128xf32>
    %c7_i32 = arith.constant 7 : i32
    %56 = arith.addi %6, %c7_i32 : i32
    %57 = arith.index_cast %56 : i32 to index
    %58 = memref.load %arg4[%57] : memref<16xf32, #tpu.memory_space<smem>>
    %c0_26 = arith.constant 0 : index
    %c0_27 = arith.constant 0 : index
    %c0_28 = arith.constant 0 : index
    %59 = vector.load %arg12[%c0_26, %c0_27, %c0_28] : memref<1x1x128xf32, #tpu.memory_space<vmem>>, vector<1x1x128xf32>
    %60 = vector.broadcast %58 : f32 to vector<1x1x128xf32>
    %61 = arith.mulf %60, %59 : vector<1x1x128xf32>
    %62 = arith.addf %55, %61 : vector<1x1x128xf32>
    %c0_29 = arith.constant 0 : index
    %c0_30 = arith.constant 0 : index
    %c0_31 = arith.constant 0 : index
    %63 = vector.load %arg13[%c0_29, %c0_30, %c0_31] : memref<1x1x128xf32, #tpu.memory_space<vmem>>, vector<1x1x128xf32>
    tpu.vector_store %arg13[%c0_29, %c0_30, %c0_31], %62 {strides = array<i32>} : memref<1x1x128xf32, #tpu.memory_space<vmem>>, vector<1x1x128xf32>,
    return
  }
  func.func @transform_0(%arg0: i32, %arg1: i32, %arg2: i32, %arg3: memref<16xi32, #tpu.memory_space<smem>>) -> i32 {
    %c0_i32 = arith.constant 0 : i32
    %c0_i32_0 = arith.constant 0 : i32
    return %c0_i32 : i32
  }
  func.func @transform_1(%arg0: i32, %arg1: i32, %arg2: i32, %arg3: memref<16xi32, #tpu.memory_space<smem>>) -> (i32, i32, i32) {
    %c8_i32 = arith.constant 8 : i32
    %0 = arith.muli %arg0, %c8_i32 : i32
    %c8_i32_0 = arith.constant 8 : i32
    %1 = arith.muli %arg2, %c8_i32_0 : i32
    %2 = arith.addi %0, %1 : i32
    %c0_i32 = arith.constant 0 : i32
    %3 = arith.addi %2, %c0_i32 : i32
    %4 = arith.index_cast %3 : i32 to index
    %5 = memref.load %arg3[%4] : memref<16xi32, #tpu.memory_space<smem>>
    %c0_i32_1 = arith.constant 0 : i32
    %c0_i32_2 = arith.constant 0 : i32
    return %5, %arg1, %c0_i32_1 : i32, i32, i32
  }
  func.func @transform_2(%arg0: i32, %arg1: i32, %arg2: i32, %arg3: memref<16xi32, #tpu.memory_space<smem>>) -> (i32, i32, i32) {
    %c8_i32 = arith.constant 8 : i32
    %0 = arith.muli %arg0, %c8_i32 : i32
    %c8_i32_0 = arith.constant 8 : i32
    %1 = arith.muli %arg2, %c8_i32_0 : i32
    %2 = arith.addi %0, %1 : i32
    %c1_i32 = arith.constant 1 : i32
    %3 = arith.addi %2, %c1_i32 : i32
    %4 = arith.index_cast %3 : i32 to index
    %5 = memref.load %arg3[%4] : memref<16xi32, #tpu.memory_space<smem>>
    %c0_i32 = arith.constant 0 : i32
    %c0_i32_1 = arith.constant 0 : i32
    return %5, %arg1, %c0_i32 : i32, i32, i32
  }
  func.func @transform_3(%arg0: i32, %arg1: i32, %arg2: i32, %arg3: memref<16xi32, #tpu.memory_space<smem>>) -> (i32, i32, i32) {
    %c8_i32 = arith.constant 8 : i32
    %0 = arith.muli %arg0, %c8_i32 : i32
    %c8_i32_0 = arith.constant 8 : i32
    %1 = arith.muli %arg2, %c8_i32_0 : i32
    %2 = arith.addi %0, %1 : i32
    %c2_i32 = arith.constant 2 : i32
    %3 = arith.addi %2, %c2_i32 : i32
    %4 = arith.index_cast %3 : i32 to index
    %5 = memref.load %arg3[%4] : memref<16xi32, #tpu.memory_space<smem>>
    %c0_i32 = arith.constant 0 : i32
    %c0_i32_1 = arith.constant 0 : i32
    return %5, %arg1, %c0_i32 : i32, i32, i32
  }
  func.func @transform_4(%arg0: i32, %arg1: i32, %arg2: i32, %arg3: memref<16xi32, #tpu.memory_space<smem>>) -> (i32, i32, i32) {
    %c8_i32 = arith.constant 8 : i32
    %0 = arith.muli %arg0, %c8_i32 : i32
    %c8_i32_0 = arith.constant 8 : i32
    %1 = arith.muli %arg2, %c8_i32_0 : i32
    %2 = arith.addi %0, %1 : i32
    %c3_i32 = arith.constant 3 : i32
    %3 = arith.addi %2, %c3_i32 : i32
    %4 = arith.index_cast %3 : i32 to index
    %5 = memref.load %arg3[%4] : memref<16xi32, #tpu.memory_space<smem>>
    %c0_i32 = arith.constant 0 : i32
    %c0_i32_1 = arith.constant 0 : i32
    return %5, %arg1, %c0_i32 : i32, i32, i32
  }
  func.func @transform_5(%arg0: i32, %arg1: i32, %arg2: i32, %arg3: memref<16xi32, #tpu.memory_space<smem>>) -> (i32, i32, i32) {
    %c8_i32 = arith.constant 8 : i32
    %0 = arith.muli %arg0, %c8_i32 : i32
    %c8_i32_0 = arith.constant 8 : i32
    %1 = arith.muli %arg2, %c8_i32_0 : i32
    %2 = arith.addi %0, %1 : i32
    %c4_i32 = arith.constant 4 : i32
    %3 = arith.addi %2, %c4_i32 : i32
    %4 = arith.index_cast %3 : i32 to index
    %5 = memref.load %arg3[%4] : memref<16xi32, #tpu.memory_space<smem>>
    %c0_i32 = arith.constant 0 : i32
    %c0_i32_1 = arith.constant 0 : i32
    return %5, %arg1, %c0_i32 : i32, i32, i32
  }
  func.func @transform_6(%arg0: i32, %arg1: i32, %arg2: i32, %arg3: memref<16xi32, #tpu.memory_space<smem>>) -> (i32, i32, i32) {
    %c8_i32 = arith.constant 8 : i32
    %0 = arith.muli %arg0, %c8_i32 : i32
    %c8_i32_0 = arith.constant 8 : i32
    %1 = arith.muli %arg2, %c8_i32_0 : i32
    %2 = arith.addi %0, %1 : i32
    %c5_i32 = arith.constant 5 : i32
    %3 = arith.addi %2, %c5_i32 : i32
    %4 = arith.index_cast %3 : i32 to index
    %5 = memref.load %arg3[%4] : memref<16xi32, #tpu.memory_space<smem>>
    %c0_i32 = arith.constant 0 : i32
    %c0_i32_1 = arith.constant 0 : i32
    return %5, %arg1, %c0_i32 : i32, i32, i32
  }
  func.func @transform_7(%arg0: i32, %arg1: i32, %arg2: i32, %arg3: memref<16xi32, #tpu.memory_space<smem>>) -> (i32, i32, i32) {
    %c8_i32 = arith.constant 8 : i32
    %0 = arith.muli %arg0, %c8_i32 : i32
    %c8_i32_0 = arith.constant 8 : i32
    %1 = arith.muli %arg2, %c8_i32_0 : i32
    %2 = arith.addi %0, %1 : i32
    %c6_i32 = arith.constant 6 : i32
    %3 = arith.addi %2, %c6_i32 : i32
    %4 = arith.index_cast %3 : i32 to index
    %5 = memref.load %arg3[%4] : memref<16xi32, #tpu.memory_space<smem>>
    %c0_i32 = arith.constant 0 : i32
    %c0_i32_1 = arith.constant 0 : i32
    return %5, %arg1, %c0_i32 : i32, i32, i32
  }
  func.func @transform_8(%arg0: i32, %arg1: i32, %arg2: i32, %arg3: memref<16xi32, #tpu.memory_space<smem>>) -> (i32, i32, i32) {
    %c8_i32 = arith.constant 8 : i32
    %0 = arith.muli %arg0, %c8_i32 : i32
    %c8_i32_0 = arith.constant 8 : i32
    %1 = arith.muli %arg2, %c8_i32_0 : i32
    %2 = arith.addi %0, %1 : i32
    %c7_i32 = arith.constant 7 : i32
    %3 = arith.addi %2, %c7_i32 : i32
    %4 = arith.index_cast %3 : i32 to index
    %5 = memref.load %arg3[%4] : memref<16xi32, #tpu.memory_space<smem>>
    %c0_i32 = arith.constant 0 : i32
    %c0_i32_1 = arith.constant 0 : i32
    return %5, %arg1, %c0_i32 : i32, i32, i32
  }
  func.func @transform_9(%arg0: i32, %arg1: i32, %arg2: i32, %arg3: memref<16xi32, #tpu.memory_space<smem>>) -> (i32, i32, i32) {
    %c0_i32 = arith.constant 0 : i32
    %c0_i32_0 = arith.constant 0 : i32
    return %arg0, %arg1, %c0_i32 : i32, i32, i32
  }
}

</mosaic_0001>

<bundles_post_ra>
// kernel: tpu_custom_call.1
= control target key start
LH: loop header
LB: loop body
LE: loop exit
PB: predicated region body
PF: predicated region fallthrough
CT: control target
= control target key end

     0   :  { %s2039_s16 = smov [#allocation3]   ;;  %s2988_s0 = inlined_call_operand.hbm [shape: s32[16], index: 0, kind: input, shape index: {}]   ;;  %s2989_s1 = inlined_call_operand.hbm [shape: f32[16], index: 1, kind: input, shape index: {}]   ;;  %s2990_s2 = inlined_call_operand.hbm [shape: f32[32,1,128], index: 2, kind: input, shape index: {}]   ;;  %s2991_s3 = inlined_call_operand.hbm [shape: f32[32,1,128], index: 3, kind: input, shape index: {}]   ;;  %s2992_s4 = inlined_call_operand.hbm [shape: f32[32,1,128], index: 4, kind: input, shape index: {}]   ;;  %s2993_s5 = inlined_call_operand.hbm [shape: f32[32,1,128], index: 5, kind: input, shape index: {}]   ;;  %s2994_s6 = inlined_call_operand.hbm [shape: f32[32,1,128], index: 6, kind: input, shape index: {}]   ;;  %s2995_s7 = inlined_call_operand.hbm [shape: f32[32,1,128], index: 7, kind: input, shape index: {}]   ;;  %s2996_s8 = inlined_call_operand.hbm [shape: f32[32,1,128], index: 8, kind: input, shape index: {}]   ;;  %s2997_s9 = inlined_call_operand.hbm [shape: f32[32,1,128], index: 9, kind: input, shape index: {}]   ;;  %s2998_s10 = inlined_call_operand.hbm [shape: f32[2,1,128], index: 10, kind: output, shape index: {}]  }
   0x1   :  { %3071 = sst [smem:[#allocation87_spill]] %s2989_s1  ;;  %s16_s15 = sshll.u32 %s2988_s0, 4  ;;  %s17_s15 = int_to_ptr.hbm [resolvable:$true] %s16_s15 }
   0x2   :  { %3072 = sst [smem:[#allocation88_spill]] %s2990_s2 }
   0x3   :  { %3073 = sst [smem:[#allocation89_spill]] %s2991_s3 }
   0x4   :  { %3074 = sst [smem:[#allocation90_spill]] %s2992_s4 }
   0x5   :  { %3075 = sst [smem:[#allocation91_spill]] %s2993_s5 }
   0x6   :  { %3076 = sst [smem:[#allocation92_spill]] %s2994_s6 }
   0x7   :  { %3077 = sst [smem:[#allocation93_spill]] %s2995_s7 }
   0x8   :  { %3078 = sst [smem:[#allocation94_spill]] %s2996_s8 }
   0x9   :  { %3079 = sst [smem:[#allocation95_spill]] %s2997_s9 }
   0xa   :  { %3080 = sst [smem:[#allocation96_spill]] %s2998_s10 }
   0xb   :  { %19 = dma.hbm_to_smem %s17_s15, 16, %s2039_s16, [#allocation2] }
   0xc   :  { %1877 = dma.done.wait [#allocation2], 16 }
   0xd   :  { %1878 = vsyncadd [#allocation2], 4294967280 }
   0xe   :  { %22 = sfence }
   0xf   :  { %23 = vsyncpa [#allocation7], 0 }
  0x10   :  { %24 = vsyncpa [#allocation5], 0 }
  0x11   :  { %26 = vsyncpa [#allocation5 + $0x1], 0 }
  0x12   :  { %27 = vsyncpa [#allocation10], 0 }
  0x13   :  { %29 = vsyncpa [#allocation10 + $0x1], 0 }
  0x14   :  { %30 = vsyncpa [#allocation13], 0 }
  0x15   :  { %32 = vsyncpa [#allocation13 + $0x1], 0 }
  0x16   :  { %33 = vsyncpa [#allocation16], 0 }
  0x17   :  { %35 = vsyncpa [#allocation16 + $0x1], 0 }
  0x18   :  { %36 = vsyncpa [#allocation19], 0 }
  0x19   :  { %38 = vsyncpa [#allocation19 + $0x1], 0 }
  0x1a   :  { %39 = vsyncpa [#allocation6], 0 }
  0x1b   :  { %41 = vsyncpa [#allocation6 + $0x1], 0  ;;  %s2100_s0 = smov 0   ;;  %s2102_s17 = smov 0  }
  0x1c   :  { %s2104_s18 = smov 0   ;;  %s2106_s19 = smov 0  }
  0x1d   :  { %s2108_s20 = smov 0   ;;  %s2110_s21 = smov 0  }
  0x1e   :  { %s2112_s22 = smov 0   ;;  %s2114_s23 = smov 0  }
  0x1f   :  { %s2116_s24 = smov 0   ;;  %s2118_s25 = smov 0  }
  0x20   :  { %s2120_s26 = smov 0   ;;  %s2122_s27 = smov 0  }
  0x21   :  { %s2124_s28 = smov 0   ;;  %s2126_s29 = smov 0  }
  0x22   :  { %s2128_s30 = smov 0   ;;  %s2130_s11 = smov 0  }
  0x23   :  { %3081 = sst [smem:[#allocation48_spill]] %s2130_s11  ;;  %s2132_s12 = smov 0  }
  0x24   :  { %s2134_s13 = smov 0   ;;  %s2136_s14 = smov 0  }
  0x25   :  { %s2138_s15 = smov 0   ;;  %s2140_s16 = smov 0  }
  0x26   :  { %s2142_s10 = smov 0   ;;  %s2144_s9 = smov 0  }
  0x27   :  { %s2146_s8 = smov 0   ;;  %s2148_s6 = smov 0  }
  0x28   :  { %3082 = sst [smem:[#allocation49_spill]] %s2146_s8  ;;  %s2150_s4 = smov 0  }
  0x29   :  { %3083 = sst [smem:[#allocation50_spill]] %s2148_s6  ;;  %s2152_s2 = smov 0  }
  0x2a   :  { %3084 = sst [smem:[#allocation51_spill]] %s2150_s4  ;;  %s2154_s7 = smov 0  }
  0x2b   :  { %s2156_s1 = smov 0   ;;  %s2158_s5 = smov 0  }
  0x2c LB: > { %s3089_s11 = sld [smem:[#allocation48_spill]]  ;;  %p3040_p1 = scmp.eq.s32.totalorder %s2037_s5, 0  ;;  %s2037_s5 = sphi %s2158_s5, %s3309_s5   ;;  %s2033_s1 = sphi %s2156_s1, %s3308_s1   ;;  %s2029_s7 = sphi %s2154_s7, %s3307_s7   ;;  %s2025_s2 = sphi %s2152_s2, %s3306_s2   ;;  %s2009_s9 = sphi %s2144_s9, %s3290_s9   ;;  %s2005_s10 = sphi %s2142_s10, %s3289_s10   ;;  %s2001_s16 = sphi %s2140_s16, %s3287_s16   ;;  %s1997_s15 = sphi %s2138_s15, %s3302_s15   ;;  %s1993_s14 = sphi %s2136_s14, %s3285_s14   ;;  %s1989_s13 = sphi %s2134_s13, %s3284_s13   ;;  %s1985_s12 = sphi %s2132_s12, %s3301_s12   ;;  %s1977_s30 = sphi %s2128_s30, %s3280_s30   ;;  %s1973_s29 = sphi %s2126_s29, %s3279_s29   ;;  %s1969_s28 = sphi %s2124_s28, %s3278_s28   ;;  %s1965_s27 = sphi %s2122_s27, %s3277_s27   ;;  %s1961_s26 = sphi %s2120_s26, %s3276_s26   ;;  %s1957_s25 = sphi %s2118_s25, %s3275_s25   ;;  %s1953_s24 = sphi %s2116_s24, %s3274_s24   ;;  %s1949_s23 = sphi %s2114_s23, %s3291_s23   ;;  %s1945_s22 = sphi %s2112_s22, %s3272_s22   ;;  %s1941_s21 = sphi %s2110_s21, %s3288_s21   ;;  %s1937_s20 = sphi %s2108_s20, %s3271_s20   ;;  %s1933_s19 = sphi %s2106_s19, %s3270_s19   ;;  %s1929_s18 = sphi %s2104_s18, %s3269_s18   ;;  %s1925_s17 = sphi %s2102_s17, %s3268_s17   ;;  %s1921_s0 = sphi %s2100_s0, %s3267_s0  }
  0x2d   : > { %3090 = sst [smem:[#allocation48_spill]] %s1921_s0  ;;  %p155_p4 = scmp.ne.s32.totalorder %s2009_s9, %s2005_s10 }
  0x2e   : > { %3091 = sst [smem:[#allocation52_spill]] %s1925_s17  ;;  %s398_s10 = sadd.s32 1, %s1929_s18 }
  0x2f   : > { %3092 = sst [smem:[#allocation53_spill]] %s1929_s18  ;;  %p408_p8 = scmp.ne.s32.totalorder %s1929_s18, %s1925_s17 }
  0x30   : > { %3093 = sst [smem:[#allocation54_spill]] %s1933_s19  ;;  %s2249_s19 = sadd.s32 4294967295, %s2037_s5  }
  0x31   : > { %3094 = sst [smem:[#allocation55_spill]] %s1937_s20  ;;  %s66_s20 = sadd.s32 1, %s2033_s1 }
  0x32   : > { %3095 = sst [smem:[#allocation56_spill]] %s1941_s21  ;;  %s1095_s21 = sadd.s32 4294967294, %s2037_s5  }
  0x33   : > { %3096 = sst [smem:[#allocation57_spill]] %s1945_s22  ;;  %s2254_s22 = sshll.u32 %s2033_s1, 3 }
  0x34   : > { %3097 = sst [smem:[#allocation58_spill]] %s1949_s23  ;;  %p68_p0 = scmp.ge.s32.totalorder %s66_s20, 2 }
  0x35   : > { %s3098_s8 = sld [smem:[#allocation49_spill]]  ;;  %p3036_p2 = scmp.eq.s32.totalorder %s2249_s19, 0 }
  0x36   : > { %3099 = sst [smem:[#allocation49_spill]] %s1953_s24  ;;  %s3311_s20 = smov (%p68_p0, %s66_s20), 0 }
  0x37   : > { %s3100_s6 = sld [smem:[#allocation50_spill]]  ;;  %p2279_p6 = por %p155_p4, %p3036_p2 }
  0x38   : > { %s3101_s4 = sld [smem:[#allocation51_spill]]  ;;  %p409_p9 = scmp.eq.s32.totalorder %s2249_s19, 1 }
  0x39   : > { %3102 = sst [smem:[#allocation51_spill]] %s1961_s26  ;;  %p414_p11 = scmp.ne.s32.totalorder %s1925_s17, %s1921_s0 }
  0x3a   : > { %3103 = sst [smem:[#allocation50_spill]] %s1965_s27  ;;  %p2292_p10 = por %p409_p9, %p408_p8 }
  0x3b   : > { %3104 = sst [smem:[#allocation59_spill]] %s1969_s28  ;;  %s142_s24 = sadd.s32 1, %s3098_s8 }
  0x3c   : > { %3105 = sst [smem:[#allocation60_spill]] %s1973_s29  ;;  %s3120_s29 = smov %s3311_s20 }
  0x3d   : > { %3106 = sst [smem:[#allocation61_spill]] %s1977_s30  ;;  %s2265_s28 = sshll.u32 %s3120_s29, 3 }
  0x3e   : > { %3107 = sst [smem:[#allocation62_spill]] %s1989_s13  ;;  %p149_p3 = scmp.ne.s32.totalorder %s3098_s8, %s2009_s9 }
  0x3f   : > { %3108 = sst [smem:[#allocation63_spill]] %s1993_s14  ;;  %s135_s30 = sadd.s32 1, %s2265_s28 }
  0x40   : > { %3109 = sst [smem:[#allocation64_spill]] %s1997_s15  ;;  %p2273_p5 = por %p149_p3, %p3040_p1 }
  0x41   : > { %3110 = sst [smem:[#allocation65_spill]] %s2001_s16  ;;  %p415_p12 = scmp.eq.s32.totalorder %s1095_s21, 1 }
  0x42   : > { %3111 = sst [smem:[#allocation66_spill]] %s2009_s9  ;;  %p3035_p4 = scmp.lt.s32.totalorder %s2037_s5, 2 }
  0x43   : > { %3112 = sst [smem:[#allocation67_spill]] %s3098_s8  ;;  %p2298_p0 = por %p415_p12, %p414_p11 }
  0x44   : > { %3113 = sst [smem:[#allocation68_spill]] %s3100_s6  ;;  %s218_s0 = sadd.s32 1, %s1989_s13 }
  0x45   : > { %3114 = sst [smem:[#allocation69_spill]] %s3101_s4 }
  0x46   : > { %3115 = sst [smem:[#allocation70_spill]] %s2025_s2 }
  0x47   : > { %3116 = sst [smem:[#allocation71_spill]] %s2029_s7  ;;  %s3019_s7 = sadd.s32 1, %s2254_s22 }
  0x48   : > { %3117 = sst [smem:[#allocation72_spill]] %s2033_s1 }
  0x49   : > { %3118 = sst [smem:[#allocation73_spill]] %s2037_s5 }
  0x4a   : > { %3119 = sst [smem:[#allocation74_spill]] %s3311_s20 }
  0x4b   : > { %s131_s23 = sld [smem:[#allocation3 + %s3019_s7]]  ;;  %s393_s7 = ssub.s32 %s2033_s1, %s3120_s29 }
  0x4c   : > { %s136_s14 = sld [smem:[#allocation3 + %s135_s30]]  ;;  %p396_p7 = scmp.eq.s32.totalorder %s393_s7, 0 }
  0x4d   : > { %s3122_s20 = scalar_select %p2279_p6, 1, 0 }
  0x4e   : > { %s2290_s30 = scalar_select %p396_p7, %s1929_s18, %s398_s10  }
  0x4f   : > { %3123 = sst [smem:[#allocation75_spill]] %s3122_s20  ;;  %s2308_s10 = sand.u32 1, %s2037_s5  }
  0x50   : > { %3124 = sst [smem:[#allocation76_spill]] %s2290_s30  ;;  %s469_s30 = sand.u32 1, %s3098_s8  }
  0x51   : > { %s3125_s9 = scalar_select %p2292_p10, 1, 0 }
  0x52   : > { %s137_s29 = ssub.s32 %s131_s23, %s136_s14  ;;  %p2315_p7 = pnand %p3035_p4, %p2273_p5 }
  0x53   : > { %3126 = sst [smem:[#allocation77_spill]] %s3125_s9  ;;  %p140_p13 = scmp.eq.s32.totalorder %s137_s29, 0 }
  0x54   : > { %s3127_s7 = scalar_select %p2298_p0, 1, 0 }
  0x55   : > { %s2304_s1 = scalar_select %p140_p13, %s3098_s8, %s142_s24  }
  0x56   : > { %3128 = sst [smem:[#allocation78_spill]] %s3127_s7  ;;  %s3131_s29 = sadd.s32 1, %s2254_s22 }
  0x57   : > { %3129 = sst [smem:[#allocation79_spill]] %s2304_s1  ;;  %s3313_s29 = smov (!%p2273_p5, %s3131_s29), 0 }
  0x58   : > { %s1133_s23 = scalar_select %p2273_p5, [#allocation3], [#allocation22] }
  0x59   : > { %s3317_s29 = smov (!%p3035_p4, %s3313_s29), 0  ;;  %s470_s24 = scalar_lea.vmem [#allocation9], %s469_s30 }
  0x5a   : > { %s3315_s23 = smov (!%p3035_p4, %s1133_s23), [#allocation30]  ;;  %s483_s14 = sshll.u32 %s470_s24, 4  ;;  %s484_s14 = int_to_ptr.vmem [resolvable:$true] %s483_s14 }
  0x5b   : > { %s475_s1 = sld [smem:[%s3315_s23 + %s3317_s29]]  ;;  %s3034_s8 = sadd.s32 3, %s2254_s22 }
  0x5c   : > { %s211_s18 = sadd.s32 3, %s2265_s28  ;;  %s207_s7 = sld [smem:[#allocation3 + %s3034_s8]] }
  0x5d   : > { %s3132_s3 = sld [smem:[#allocation89_spill]]  ;;  %p225_p5 = scmp.ne.s32.totalorder %s1989_s13, %s1985_s12 }
  0x5e   : > { %s212_s20 = sld [smem:[#allocation3 + %s211_s18]]  ;;  %s3037_s6 = scalar_lea.sflag [#allocation10], %s2308_s10 }
  0x5f   : > { %p1478_p11 = pneg %p2315_p7 }
  0x63   : > { %s479_s17 = scalar_lea.hbm %s3132_s3, %s475_s1  ;;  %s1481_s8 = scalar_lea.hbm %s3132_s3, 32 }
  0x64   : > { %s481_s16 = sshll.u32 %s479_s17, 4  ;;  %s482_s16 = int_to_ptr.hbm [resolvable:$true] %s481_s16 }
  0x65   : > { %s1474_s30 = sshra.s32 %s482_s16, 4  ;;  %s1475_s30 = int_to_ptr.hbm [resolvable:$true] %s1474_s30 }
  0x66   : > { %s1476_s23 = scalar_lea.hbm %s1475_s30, 1  ;;  %p1482_p3 = scmp.lt.s32.totalorder %s1475_s30, %s3132_s3 }
  0x67   : > { %p1477_p9 = scmp.ne.s32.totalorder %s1475_s30, %s1476_s23  ;;  %p1483_p4 = scmp.lt.s32.totalorder %s1481_s8, %s1476_s23 }
  0x69   : > { %p1479_p12 = pnand %p1478_p11, %p1477_p9  ;;  %p1484_p2 = por %p1483_p4, %p1482_p3 }
  0x6b   : > { %p1480_p13 = pneg %p1479_p12 }
  0x6d   : > { %p1485_p8 = pnand %p1484_p2, %p1480_p13 }
  0x6f   : > { %1488 = shalt.err (!%p1485_p8)
}
  0x70   : > { %1180 = dma.hbm_to_vmem [thread:$0]  (!%p2315_p7), %s482_s16, 16, %s484_s14, %s3037_s6  }
  0x71   : > { %p2359_p2 = por %p225_p5, %p3040_p1  ;;  %p3134_p3 = scmp.eq.s32.totalorder %s2249_s19, 0 }
  0x72   : > { %p3135_p4 = scmp.ne.s32.totalorder %s1985_s12, %s3089_s11  ;;  %s515_s18 = sand.u32 1, %s1989_s13  }
  0x73   : > { %s213_s16 = ssub.s32 %s207_s7, %s212_s20  ;;  %s516_s21 = scalar_lea.vmem [#allocation12], %s515_s18 }
  0x74   : > { %p2368_p8 = por %p3135_p4, %p3134_p3  ;;  %p216_p7 = scmp.eq.s32.totalorder %s213_s16, 0 }
  0x75   : > { %s529_s14 = sshll.u32 %s516_s21, 4  ;;  %s3138_s30 = sadd.s32 3, %s2254_s22  ;;  %s530_s14 = int_to_ptr.vmem [resolvable:$true] %s529_s14 }
  0x76   : > { %s3136_s17 = scalar_select %p2368_p8, 1, 0 }
  0x77   : > { %s1139_s15 = scalar_select %p2359_p2, [#allocation3], [#allocation24] }
  0x78   : > { %s2378_s11 = scalar_select %p216_p7, %s1989_s13, %s218_s0  }
  0x79   : > { %s3319_s30 = smov (!%p2359_p2, %s3138_s30), 0  ;;  %p3139_p5 = scmp.lt.s32.totalorder %s2037_s5, 2 }
  0x7a   : > { %3137 = sst [smem:[#allocation80_spill]] %s2378_s11  ;;  %s3039_s0 = sadd.s32 5, %s2254_s22 }
  0x7b   : > { %s3321_s15 = smov (!%p3139_p5, %s1139_s15), [#allocation32]  ;;  %p3140_p9 = pmov %p3139_p5 }
  0x7c   : > { %p3141_p11 = pmov %p3139_p5  ;;  %s287_s23 = sadd.s32 5, %s2265_s28 }
  0x7d   : > { %s3323_s30 = smov (!%p3140_p9, %s3319_s30), 0  ;;  %s283_s29 = sld [smem:[#allocation3 + %s3039_s0]] }
  0x7e   : > { %p2392_p12 = pnand %p3141_p11, %p2359_p2  ;;  %s521_s7 = sld [smem:[%s3321_s15 + %s3323_s30]] }
  0x7f   : > { %s294_s24 = sadd.s32 1, %s1965_s27  ;;  %s3143_s18 = sld [smem:[#allocation91_spill]] }
  0x80   : > { %s288_s21 = sld [smem:[#allocation3 + %s287_s23]]  ;;  %s3043_s8 = scalar_lea.sflag [#allocation13], %s2308_s10 }
  0x81   : > { %p1508_p4 = pneg %p2392_p12 }
  0x85   : > { %s3144_s6 = smov %s3143_s18  ;;  %s525_s16 = scalar_lea.hbm %s3143_s18, %s521_s7 }
  0x86   : > { %s527_s3 = sshll.u32 %s525_s16, 4  ;;  %s1511_s0 = scalar_lea.hbm %s3144_s6, 32  ;;  %s528_s3 = int_to_ptr.hbm [resolvable:$true] %s527_s3 }
  0x87   : > { %s1504_s11 = sshra.s32 %s528_s3, 4  ;;  %s1505_s11 = int_to_ptr.hbm [resolvable:$true] %s1504_s11 }
  0x88   : > { %s1506_s13 = scalar_lea.hbm %s1505_s11, 1  ;;  %p1512_p9 = scmp.lt.s32.totalorder %s1505_s11, %s3144_s6 }
  0x89   : > { %p1507_p2 = scmp.ne.s32.totalorder %s1505_s11, %s1506_s13  ;;  %p1513_p11 = scmp.lt.s32.totalorder %s1511_s0, %s1506_s13 }
  0x8b   : > { %p1509_p7 = pnand %p1508_p4, %p1507_p2  ;;  %p1514_p13 = por %p1513_p11, %p1512_p9 }
  0x8d   : > { %p1510_p5 = pneg %p1509_p7 }
  0x8f   : > { %p1515_p3 = pnand %p1514_p13, %p1510_p5 }
  0x91   : > { %1518 = shalt.err (!%p1515_p3)
}
  0x92   : > { %1190 = dma.hbm_to_vmem [thread:$0]  (!%p2392_p12), %s528_s3, 16, %s530_s14, %s3043_s8  }
  0x93   : > { %p3145_p13 = scmp.ne.s32.totalorder %s1965_s27, %s1961_s26  ;;  %p3147_p2 = scmp.eq.s32.totalorder %s2249_s19, 0 }
  0x94   : > { %p3148_p4 = scmp.ne.s32.totalorder %s1961_s26, %s1957_s25  ;;  %s561_s20 = sand.u32 1, %s1965_s27  }
  0x95   : > { %p2426_p3 = por %p3145_p13, %p3040_p1  ;;  %s289_s0 = ssub.s32 %s283_s29, %s288_s21 }
  0x96   : > { %p2435_p7 = por %p3148_p4, %p3147_p2  ;;  %p292_p12 = scmp.eq.s32.totalorder %s289_s0, 0 }
  0x97   : > { %s562_s3 = scalar_lea.vmem [#allocation15], %s561_s20  ;;  %s3152_s18 = sadd.s32 5, %s2254_s22 }
  0x98   : > { %s3149_s11 = scalar_select %p2435_p7, 1, 0 }
  0x99   : > { %s575_s14 = sshll.u32 %s562_s3, 4  ;;  %s3325_s18 = smov (!%p2426_p3, %s3152_s18), 0  ;;  %s576_s14 = int_to_ptr.vmem [resolvable:$true] %s575_s14 }
  0x9a   : > { %3150 = sst [smem:[#allocation81_spill]] %s3149_s11  ;;  %p3153_p5 = scmp.lt.s32.totalorder %s2037_s5, 2 }
  0x9b   : > { %s1145_s23 = scalar_select %p2426_p3, [#allocation3], [#allocation26] }
  0x9c   : > { %s2445_s1 = scalar_select %p292_p12, %s1965_s27, %s294_s24  }
  0x9d   : > { %s3327_s23 = smov (!%p3153_p5, %s1145_s23), [#allocation34]  ;;  %p3154_p9 = pmov %p3153_p5 }
  0x9e   : > { %3151 = sst [smem:[#allocation82_spill]] %s2445_s1  ;;  %p3155_p11 = pmov %p3153_p5 }
  0x9f   : > { %s3329_s18 = smov (!%p3154_p9, %s3325_s18), 0  ;;  %p1112_p2 = scmp.ge.s32.totalorder %s2037_s5, 1 }
  0xa0   : > { %p2459_p13 = pnand %p3155_p11, %p2426_p3  ;;  %s567_s29 = sld [smem:[%s3327_s23 + %s3329_s18]] }
  0xa1   : > { %p422_p4 = scmp.lt.s32.totalorder %s2037_s5, 3  ;;  %s3157_s21 = sld [smem:[#allocation87_spill]] }
  0xa2   : > { %s3159_s13 = sld [smem:[#allocation93_spill]]  ;;  %p3161_p5 = scmp.eq.s32.totalorder %s2249_s19, 0 }
  0xa3   : > { %p2468_p12 = pnand %p1112_p2, %p422_p4  ;;  %s3042_s18 = scalar_lea.sflag [#allocation16], %s2308_s10 }
  0xa4   : > { %p1538_p2 = pneg %p2459_p13 }
  0xa5   : > { %p1166_p3 = pneg %p2468_p12 }
  0xa7   : > { %s434_s15 = sshll.u32 %s3157_s21, 4  ;;  %p2479_p9 = pnand %p1166_p3, %p3161_p5  ;;  %s435_s15 = int_to_ptr.hbm [resolvable:$true] %s434_s15 }
  0xa8   : > { %s3160_s3 = smov %s3159_s13  ;;  %s571_s20 = scalar_lea.hbm %s3159_s13, %s567_s29 }
  0xa9   : > { %s573_s0 = sshll.u32 %s571_s20, 4  ;;  %s1541_s9 = scalar_lea.hbm %s3160_s3, 32  ;;  %s574_s0 = int_to_ptr.hbm [resolvable:$true] %s573_s0 }
  0xaa   : > { %s1534_s24 = sshra.s32 %s574_s0, 4  ;;  %s1535_s24 = int_to_ptr.hbm [resolvable:$true] %s1534_s24 }
  0xab   : > { %s1536_s16 = scalar_lea.hbm %s1535_s24, 1  ;;  %p1542_p3 = scmp.lt.s32.totalorder %s1535_s24, %s3160_s3 }
  0xac   : > { %p1537_p11 = scmp.ne.s32.totalorder %s1535_s24, %s1536_s16  ;;  %p1543_p5 = scmp.lt.s32.totalorder %s1541_s9, %s1536_s16 }
  0xae   : > { %p1539_p4 = pnand %p1538_p2, %p1537_p11  ;;  %p1544_p0 = por %p1543_p5, %p1542_p3 }
  0xb0   : > { %p1540_p1 = pneg %p1539_p4 }
  0xb2   : > { %p1545_p10 = pnand %p1544_p0, %p1540_p1 }
  0xb4   : > { %1548 = shalt.err (!%p1545_p10)
}
  0xb5   : > { %s3163_s20 = sld [smem:[#allocation68_spill]]  ;;  %s2040_s24 = smov [#allocation4]  }
  0xb6   : > { %1200 = dma.hbm_to_vmem [thread:$0]  (!%p2459_p13), %s574_s0, 16, %s576_s14, %s3042_s18  }
  0xb7   : > { %1169 = dma.hbm_to_smem (!%p2479_p9), %s435_s15, 16, %s2040_s24, [#allocation7]  }
  0xb8   : > { %s94_s25 = sld [smem:[#allocation3 + %s2254_s22]]  ;;  %s104_s16 = sadd.s32 1, %s2025_s2 }
  0xb9   : > { %s98_s21 = sld [smem:[#allocation3 + %s2265_s28]]  ;;  %p111_p1 = scmp.ne.s32.totalorder %s2025_s2, %s3101_s4 }
  0xba   : > { %s445_s29 = sand.u32 1, %s2025_s2   ;;  %p3164_p0 = scmp.eq.s32.totalorder %s2037_s5, 0 }
  0xbb   : > { %p117_p10 = scmp.ne.s32.totalorder %s3101_s4, %s3163_s20  ;;  %p3165_p2 = scmp.eq.s32.totalorder %s2249_s19, 0 }
  0xbc   : > { %p113_p11 = por %p3164_p0, %p111_p1  ;;  %s3167_s0 = sld [smem:[#allocation65_spill]] }
  0xbd   : > { %p2510_p13 = por %p3165_p2, %p117_p10  ;;  %s3168_s7 = sld [smem:[#allocation64_spill]] }
  0xbe   : > { %s1130_s15 = scalar_select %p113_p11, [#allocation3], [#allocation21] }
  0xbf   : > { %s1131_s23 = scalar_select %p113_p11, %s2254_s22, 0 }
  0xc0   : > { %s99_s9 = ssub.s32 %s94_s25, %s98_s21  ;;  %s448_s13 = scalar_lea.vmem [#allocation8], %s445_s29 }
  0xc1   : > { %s460_s24 = sshll.u32 %s448_s13, 4  ;;  %s3169_s20 = sld [smem:[#allocation63_spill]]  ;;  %s2515_s24 = int_to_ptr.vmem [resolvable:$true] %s460_s24 }
  0xc2   : > { %p102_p9 = scmp.eq.s32.totalorder %s99_s9, 0  ;;  %p3170_p4 = scmp.lt.s32.totalorder %s2037_s5, 2 }
  0xc3   : > { %s3051_s21 = sadd.s32 2, %s2254_s22  ;;  %s173_s9 = sadd.s32 2, %s2265_s28 }
  0xc4   : > { %s3331_s15 = smov (!%p3170_p4, %s1130_s15), [#allocation29]  ;;  %p3172_p3 = pmov %p3170_p4 }
  0xc5   : > { %s2520_s18 = scalar_select %p102_p9, %s2025_s2, %s104_s16  }
  0xc6   : > { %s3333_s23 = smov (!%p3172_p3, %s1131_s23), 0  ;;  %p3173_p5 = pmov %p3172_p3 }
  0xc7   : > { %3171 = sst [smem:[#allocation83_spill]] %s2520_s18  ;;  %s180_s1 = sadd.s32 1, %s3167_s0 }
  0xc8   : > { %p2526_p1 = pnand %p3173_p5, %p113_p11  ;;  %s452_s25 = sld [smem:[%s3331_s15 + %s3333_s23]] }
  0xc9   : > { %s169_s13 = sld [smem:[#allocation3 + %s3051_s21]]  ;;  %p187_p10 = scmp.ne.s32.totalorder %s3167_s0, %s3168_s7 }
  0xca   : > { %s174_s6 = sld [smem:[#allocation3 + %s173_s9]]  ;;  %p3177_p11 = pmov %p3164_p0 }
  0xcb   : > { %s3175_s26 = sld [smem:[#allocation88_spill]]  ;;  %s446_s15 = scalar_lea.sflag [#allocation5], %s445_s29 }
  0xcc   : > { %p2544_p2 = por %p187_p10, %p3177_p11  ;;  %p1583_p4 = pneg %p2526_p1 }
  0xd1   : > { %s3176_s4 = smov %s3175_s26  ;;  %s456_s16 = scalar_lea.hbm %s3175_s26, %s452_s25 }
  0xd2   : > { %s458_s18 = sshll.u32 %s456_s16, 4  ;;  %s1586_s11 = scalar_lea.hbm %s3176_s4, 32  ;;  %s459_s18 = int_to_ptr.hbm [resolvable:$true] %s458_s18 }
  0xd3   : > { %s1579_s23 = sshra.s32 %s459_s18, 4  ;;  %s1580_s23 = int_to_ptr.hbm [resolvable:$true] %s1579_s23 }
  0xd4   : > { %s1581_s21 = scalar_lea.hbm %s1580_s23, 1  ;;  %p1587_p10 = scmp.lt.s32.totalorder %s1580_s23, %s3176_s4 }
  0xd5   : > { %p1582_p9 = scmp.ne.s32.totalorder %s1580_s23, %s1581_s21  ;;  %p1588_p11 = scmp.lt.s32.totalorder %s1586_s11, %s1581_s21 }
  0xd7   : > { %p1584_p3 = pnand %p1583_p4, %p1582_p9  ;;  %p1589_p0 = por %p1588_p11, %p1587_p10 }
  0xd9   : > { %p1585_p5 = pneg %p1584_p3 }
  0xdb   : > { %p1590_p7 = pnand %p1589_p0, %p1585_p5 }
  0xdd   : > { %1593 = shalt.err (!%p1590_p7)
}
  0xde   : > { %1175 = dma.hbm_to_vmem [thread:$0]  (!%p2526_p1), %s459_s18, 16, %s2515_s24, %s446_s15  }
  0xdf   : > { %p3179_p0 = scmp.eq.s32.totalorder %s2249_s19, 0  ;;  %p3180_p7 = scmp.ne.s32.totalorder %s3168_s7, %s3169_s20 }
  0xe0   : > { %s492_s29 = sand.u32 1, %s3167_s0   ;;  %s3182_s21 = sld [smem:[#allocation61_spill]] }
  0xe1   : > { %p2564_p9 = por %p3180_p7, %p3179_p0  ;;  %s175_s16 = ssub.s32 %s169_s13, %s174_s6 }
  0xe2   : > { %p178_p4 = scmp.eq.s32.totalorder %s175_s16, 0  ;;  %s493_s23 = scalar_lea.vmem [#allocation11], %s492_s29 }
  0xe3   : > { %s506_s27 = sshll.u32 %s493_s23, 4  ;;  %s3183_s26 = sld [smem:[#allocation60_spill]]  ;;  %s507_s27 = int_to_ptr.vmem [resolvable:$true] %s506_s27 }
  0xe4   : > { %s1136_s11 = scalar_select %p2544_p2, [#allocation3], [#allocation23] }
  0xe5   : > { %s3335_s0 = smov (!%p178_p4, %s3167_s0), %s180_s1  ;;  %s3185_s7 = sadd.s32 2, %s2254_s22 }
  0xe6   : > { %3184 = sst [smem:[#allocation84_spill]] %s3335_s0  ;;  %s3337_s7 = smov (!%p2544_p2, %s3185_s7), 0 }
  0xe7   : > { %s3186_s20 = sld [smem:[#allocation59_spill]]  ;;  %p3187_p1 = scmp.lt.s32.totalorder %s2037_s5, 2 }
  0xe8   : > { %s3055_s1 = sadd.s32 4, %s2254_s22  ;;  %s249_s0 = sadd.s32 4, %s2265_s28 }
  0xe9   : > { %s3339_s11 = smov (!%p3187_p1, %s1136_s11), [#allocation31]  ;;  %p3188_p3 = pmov %p3187_p1 }
  0xea   : > { %p3189_p5 = pmov %p3187_p1  ;;  %s245_s18 = sld [smem:[#allocation3 + %s3055_s1]] }
  0xeb   : > { %s3341_s7 = smov (!%p3188_p3, %s3337_s7), 0  ;;  %s3191_s29 = sld [smem:[#allocation90_spill]] }
  0xec   : > { %p2588_p10 = pnand %p3189_p5, %p2544_p2  ;;  %s498_s13 = sld [smem:[%s3339_s11 + %s3341_s7]] }
  0xed   : > { %s250_s23 = sld [smem:[#allocation3 + %s249_s0]]  ;;  %p269_p0 = scmp.ne.s32.totalorder %s3183_s26, %s3186_s20 }
  0xee   : > { %p1613_p7 = pneg %p2588_p10 }
  0xf1   : > { %s3192_s4 = smov %s3191_s29 }
  0xf2   : > { %s502_s16 = scalar_lea.hbm %s3191_s29, %s498_s13  ;;  %s1616_s1 = scalar_lea.hbm %s3192_s4, 32 }
  0xf3   : > { %s504_s2 = sshll.u32 %s502_s16, 4  ;;  %s505_s2 = int_to_ptr.hbm [resolvable:$true] %s504_s2 }
  0xf4   : > { %s1609_s8 = sshra.s32 %s505_s2, 4  ;;  %s1610_s8 = int_to_ptr.hbm [resolvable:$true] %s1609_s8 }
  0xf5   : > { %s1611_s24 = scalar_lea.hbm %s1610_s8, 1  ;;  %p1617_p3 = scmp.lt.s32.totalorder %s1610_s8, %s3192_s4 }
  0xf6   : > { %p1612_p2 = scmp.ne.s32.totalorder %s1610_s8, %s1611_s24  ;;  %p1618_p5 = scmp.lt.s32.totalorder %s1616_s1, %s1611_s24 }
  0xf8   : > { %p1614_p4 = pnand %p1613_p7, %p1612_p2  ;;  %p1619_p11 = por %p1618_p5, %p1617_p3 }
  0xfa   : > { %p1615_p1 = pneg %p1614_p4 }
  0xfc   : > { %p1620_p8 = pnand %p1619_p11, %p1615_p1 }
  0xfe   : > { %1623 = shalt.err (!%p1620_p8)
}
  0xff   : > { %s3193_s13 = scalar_lea.sflag [#allocation10], %s2308_s10  ;;  %p3194_p11 = scmp.eq.s32.totalorder %s2037_s5, 0 }
 0x100   : > { %1185 = dma.hbm_to_vmem [thread:$0]  (!%p2588_p10), %s505_s2, 16, %s507_s27, %s3193_s13  }
 0x101   : > { %p3195_p8 = scmp.ne.s32.totalorder %s3182_s21, %s3183_s26  ;;  %p3197_p7 = scmp.eq.s32.totalorder %s2249_s19, 0 }
 0x102   : > { %s538_s1 = sand.u32 1, %s3182_s21   ;;  %s251_s2 = ssub.s32 %s245_s18, %s250_s23 }
 0x103   : > { %p2621_p2 = por %p3195_p8, %p3194_p11  ;;  %p2630_p4 = por %p269_p0, %p3197_p7 }
 0x104   : > { %s3199_s27 = sld [smem:[#allocation49_spill]]  ;;  %p254_p10 = scmp.eq.s32.totalorder %s251_s2, 0 }
 0x105   : > { %s3198_s6 = scalar_select %p2630_p4, 1, 0 }
 0x106   : > { %s539_s0 = scalar_lea.vmem [#allocation14], %s538_s1  ;;  %s3200_s15 = sld [smem:[#allocation58_spill]] }
 0x107   : > { %s552_s9 = sshll.u32 %s539_s0, 4  ;;  %s3201_s26 = sadd.s32 1, %s3182_s21  ;;  %s553_s9 = int_to_ptr.vmem [resolvable:$true] %s552_s9 }
 0x108   : > { %s1142_s29 = scalar_select %p2621_p2, [#allocation3], [#allocation25] }
 0x109   : > { %s3202_s20 = sld [smem:[#allocation57_spill]]  ;;  %s3343_s21 = smov (!%p254_p10, %s3182_s21), %s3201_s26 }
 0x10a   : > { %3203 = sst [smem:[#allocation85_spill]] %s3343_s21  ;;  %s3204_s16 = sadd.s32 4, %s2254_s22 }
 0x10b   : > { %s3345_s16 = smov (!%p2621_p2, %s3204_s16), 0  ;;  %p3205_p0 = scmp.lt.s32.totalorder %s2037_s5, 2 }
 0x10c   : > { %s3059_s8 = sadd.s32 6, %s2254_s22  ;;  %s325_s7 = sadd.s32 6, %s2265_s28 }
 0x10d   : > { %s3347_s29 = smov (!%p3205_p0, %s1142_s29), [#allocation33]  ;;  %p3206_p1 = pmov %p3205_p0 }
 0x10e   : > { %p3207_p3 = pmov %p3205_p0  ;;  %s321_s11 = sld [smem:[#allocation3 + %s3059_s8]] }
 0x10f   : > { %s3349_s16 = smov (!%p3206_p1, %s3345_s16), 0  ;;  %s326_s25 = sld [smem:[#allocation3 + %s325_s7]] }
 0x110   : > { %p2654_p5 = pnand %p3207_p3, %p2621_p2  ;;  %s544_s23 = sld [smem:[%s3347_s29 + %s3349_s16]] }
 0x111   : > { %s332_s13 = sadd.s32 1, %s3199_s27  ;;  %s3209_s0 = sld [smem:[#allocation92_spill]] }
 0x112   : > { %p339_p11 = scmp.ne.s32.totalorder %s3199_s27, %s3200_s15  ;;  %p3211_p2 = scmp.eq.s32.totalorder %s2037_s5, 0 }
 0x113   : > { %p1643_p0 = pneg %p2654_p5 }
 0x114   : > { %p2672_p7 = por %p339_p11, %p3211_p2 }
 0x117   : > { %s3210_s4 = smov %s3209_s0  ;;  %s548_s26 = scalar_lea.hbm %s3209_s0, %s544_s23 }
 0x118   : > { %s550_s21 = sshll.u32 %s548_s26, 4  ;;  %s1646_s23 = scalar_lea.hbm %s3210_s4, 32  ;;  %s551_s21 = int_to_ptr.hbm [resolvable:$true] %s550_s21 }
 0x119   : > { %s1639_s29 = sshra.s32 %s551_s21, 4  ;;  %s1640_s29 = int_to_ptr.hbm [resolvable:$true] %s1639_s29 }
 0x11a   : > { %s1641_s16 = scalar_lea.hbm %s1640_s29, 1  ;;  %p1647_p8 = scmp.lt.s32.totalorder %s1640_s29, %s3210_s4 }
 0x11b   : > { %p1642_p10 = scmp.ne.s32.totalorder %s1640_s29, %s1641_s16  ;;  %p1648_p11 = scmp.lt.s32.totalorder %s1646_s23, %s1641_s16 }
 0x11d   : > { %p1644_p1 = pnand %p1643_p0, %p1642_p10  ;;  %p1649_p2 = por %p1648_p11, %p1647_p8 }
 0x11f   : > { %p1645_p3 = pneg %p1644_p1 }
 0x121   : > { %p1650_p4 = pnand %p1649_p2, %p1645_p3 }
 0x123   : > { %1653 = shalt.err (!%p1650_p4)
}
 0x124   : > { %s3213_s26 = scalar_lea.sflag [#allocation13], %s2308_s10  ;;  %p3214_p8 = scmp.eq.s32.totalorder %s2249_s19, 0 }
 0x125   : > { %1195 = dma.hbm_to_vmem [thread:$0]  (!%p2654_p5), %s551_s21, 16, %s553_s9, %s3213_s26  }
 0x126   : > { %p3215_p4 = scmp.ne.s32.totalorder %s3200_s15, %s3202_s20  ;;  %s584_s29 = sand.u32 1, %s3199_s27  }
 0x127   : > { %s327_s16 = ssub.s32 %s321_s11, %s326_s25  ;;  %s585_s7 = scalar_lea.vmem [#allocation17], %s584_s29 }
 0x128   : > { %p2693_p10 = por %p3215_p4, %p3214_p8  ;;  %p330_p0 = scmp.eq.s32.totalorder %s327_s16, 0 }
 0x129   : > { %s3218_s1 = sld [smem:[#allocation55_spill]]  ;;  %s598_s2 = sshll.u32 %s585_s7, 4  ;;  %s599_s2 = int_to_ptr.vmem [resolvable:$true] %s598_s2 }
 0x12a   : > { %s3216_s18 = scalar_select %p2693_p10, 1, 0 }
 0x12b   : > { %s3219_s23 = sld [smem:[#allocation56_spill]]  ;;  %s3351_s27 = smov (!%p330_p0, %s3199_s27), %s332_s13 }
 0x12c   : > { %3217 = sst [smem:[#allocation68_spill]] %s3216_s18  ;;  %s3222_s21 = sadd.s32 6, %s2254_s22 }
 0x12d   : > { %s1148_s0 = scalar_select %p2672_p7, [#allocation3], [#allocation27] }
 0x12e   : > { %s3220_s8 = sld [smem:[#allocation54_spill]]  ;;  %s3353_s21 = smov (!%p2672_p7, %s3222_s21), 0 }
 0x12f   : > { %3221 = sst [smem:[#allocation86_spill]] %s3351_s27  ;;  %p3223_p5 = scmp.lt.s32.totalorder %s2037_s5, 2 }
 0x130   : > { %s3063_s20 = sadd.s32 7, %s2254_s22  ;;  %s363_s11 = sadd.s32 7, %s2265_s28 }
 0x131   : > { %s3355_s0 = smov (!%p3223_p5, %s1148_s0), [#allocation35]  ;;  %p3224_p1 = pmov %p3223_p5 }
 0x132   : > { %s359_s25 = sld [smem:[#allocation3 + %s3063_s20]] }
 0x133   : > { %s3357_s21 = smov (!%p3224_p1, %s3353_s21), 0  ;;  %p3225_p3 = pmov %p3224_p1 }
 0x134   : > { %s590_s9 = sld [smem:[%s3355_s0 + %s3357_s21]]  ;;  %p383_p8 = scmp.ne.s32.totalorder %s3218_s1, %s3220_s8 }
 0x135   : > { %p2715_p11 = pnand %p3225_p3, %p2672_p7  ;;  %s3227_s29 = sld [smem:[#allocation94_spill]] }
 0x136   : > { %s364_s7 = sld [smem:[#allocation3 + %s363_s11]] }
 0x137   : > { %p1673_p4 = pneg %p2715_p11 }
 0x13b   : > { %s3228_s4 = smov %s3227_s29  ;;  %s594_s16 = scalar_lea.hbm %s3227_s29, %s590_s9 }
 0x13c   : > { %s596_s27 = sshll.u32 %s594_s16, 4  ;;  %s1676_s21 = scalar_lea.hbm %s3228_s4, 32  ;;  %s597_s27 = int_to_ptr.hbm [resolvable:$true] %s596_s27 }
 0x13d   : > { %s1669_s24 = sshra.s32 %s597_s27, 4  ;;  %s1670_s24 = int_to_ptr.hbm [resolvable:$true] %s1669_s24 }
 0x13e   : > { %s1671_s18 = scalar_lea.hbm %s1670_s24, 1  ;;  %p1677_p1 = scmp.lt.s32.totalorder %s1670_s24, %s3228_s4 }
 0x13f   : > { %p1672_p7 = scmp.ne.s32.totalorder %s1670_s24, %s1671_s18  ;;  %p1678_p3 = scmp.lt.s32.totalorder %s1676_s21, %s1671_s18 }
 0x141   : > { %p1674_p0 = pnand %p1673_p4, %p1672_p7  ;;  %p1679_p2 = por %p1678_p3, %p1677_p1 }
 0x143   : > { %p1675_p5 = pneg %p1674_p0 }
 0x145   : > { %p1680_p10 = pnand %p1679_p2, %p1675_p5 }
 0x147   : > { %1683 = shalt.err (!%p1680_p10)
}
 0x148   : > { %s3229_s9 = scalar_lea.sflag [#allocation16], %s2308_s10  ;;  %p3230_p2 = scmp.eq.s32.totalorder %s2037_s5, 0 }
 0x149   : > { %1205 = dma.hbm_to_vmem [thread:$0]  (!%p2715_p11), %s597_s27, 16, %s599_s2, %s3229_s9  }
 0x14a   : > { %p3231_p10 = scmp.ne.s32.totalorder %s3219_s23, %s3218_s1  ;;  %p3232_p4 = scmp.eq.s32.totalorder %s2249_s19, 0 }
 0x14b   : > { %s365_s18 = ssub.s32 %s359_s25, %s364_s7  ;;  %s370_s15 = sadd.s32 1, %s3219_s23 }
 0x14c   : > { %p379_p7 = por %p3231_p10, %p3230_p2  ;;  %p2752_p0 = por %p383_p8, %p3232_p4 }
 0x14d   : > { %p368_p5 = scmp.eq.s32.totalorder %s365_s18, 0  ;;  %s605_s20 = sand.u32 1, %s3219_s23  }
 0x14e   : > { %s1151_s11 = scalar_select %p379_p7, [#allocation3], [#allocation28] }
 0x14f   : > { %s3359_s23 = smov (!%p368_p5, %s3219_s23), %s370_s15  ;;  %s3234_s26 = sadd.s32 7, %s2254_s22 }
 0x150   : > { %s3361_s26 = smov (!%p379_p7, %s3234_s26), 0  ;;  %p3235_p1 = scmp.lt.s32.totalorder %s2037_s5, 2 }
 0x151   : > { %s608_s1 = scalar_lea.vmem [#allocation18], %s605_s20  ;;  %s3239_s16 = sld [smem:[#allocation95_spill]] }
 0x152   : > { %s3363_s11 = smov (!%p3235_p1, %s1151_s11), [#allocation36]  ;;  %p3236_p11 = pmov %p3235_p1 }
 0x153   : > { %p3237_p3 = pmov %p3235_p1  ;;  %s621_s2 = sshll.u32 %s608_s1, 4  ;;  %s622_s2 = int_to_ptr.vmem [resolvable:$true] %s621_s2 }
 0x154   : > { %s3365_s26 = smov (!%p3236_p11, %s3361_s26), 0  ;;  %s606_s24 = scalar_lea.sflag [#allocation19], %s605_s20 }
 0x155   : > { %p2769_p2 = pnand %p3237_p3, %p379_p7  ;;  %s613_s8 = sld [smem:[%s3363_s11 + %s3365_s26]] }
 0x157   : > { %s3240_s4 = smov %s3239_s16  ;;  %p1703_p10 = pneg %p2769_p2 }
 0x158   : > { %s1706_s9 = scalar_lea.hbm %s3240_s4, 32 }
 0x15b   : > { %s617_s7 = scalar_lea.hbm %s3239_s16, %s613_s8 }
 0x15c   : > { %s619_s22 = sshll.u32 %s617_s7, 4  ;;  %s620_s22 = int_to_ptr.hbm [resolvable:$true] %s619_s22 }
 0x15d   : > { %s1699_s28 = sshra.s32 %s620_s22, 4  ;;  %s1700_s28 = int_to_ptr.hbm [resolvable:$true] %s1699_s28 }
 0x15e   : > { %s1701_s0 = scalar_lea.hbm %s1700_s28, 1  ;;  %p1707_p5 = scmp.lt.s32.totalorder %s1700_s28, %s3240_s4 }
 0x15f   : > { %p1702_p8 = scmp.ne.s32.totalorder %s1700_s28, %s1701_s0  ;;  %p1708_p1 = scmp.lt.s32.totalorder %s1706_s9, %s1701_s0 }
 0x161   : > { %p1704_p7 = pnand %p1703_p10, %p1702_p8  ;;  %p1709_p11 = por %p1708_p1, %p1707_p5 }
 0x163   : > { %p1705_p4 = pneg %p1704_p7 }
 0x165   : > { %p1710_p3 = pnand %p1709_p11, %p1705_p4 }
 0x167   : > { %1713 = shalt.err (!%p1710_p3)
}
 0x168   : > { %1210 = dma.hbm_to_vmem [thread:$0]  (!%p2769_p2), %s620_s22, 16, %s622_s2, %s606_s24  }
 0x169   : > { %630 = sbr.rel (%p2468_p12) target bundleno = 474 (0x1da), region = 56  ;;  %p3241_p8 = scmp.eq.s32.totalorder (!%p2468_p12), %s2249_s19, 0 }
 0x16e   : > { %1880 = dma.done.wait (%p3241_p8), [#allocation7], 16   ;;  %p3242_p10 = pmov %p3241_p8 }
 0x16f   : > { %s3243_s20 = sld [smem:[#allocation69_spill]] }
 0x170   : > { %1882 = vsyncadd (%p3242_p10), [#allocation7], 4294967280 }
 0x175   : > { %s637_s11 = sand.u32 1, %s3243_s20  }
 0x176   : > { %s638_s26 = scalar_lea.sflag [#allocation5], %s637_s11  ;;  %s2793_s8 = scalar_lea.vmem [#allocation8], %s637_s11 }
 0x177   : > { %1884 = dma.done.wait (%p2510_p13), %s638_s26, 16  }
 0x178   : > { %1886 = vsyncadd (%p2510_p13), %s638_s26, 4294967280  ;;  %s3244_s30 = sld [smem:[#allocation66_spill]]  ;;  %s646_s1 = sand.u32 1, %s2249_s19  }
 0x179   : > { %s647_s25 = scalar_lea.sflag [#allocation10], %s646_s1 }
 0x17e   : > { %s648_s2 = sand.u32 1, %s3244_s30  }
 0x17f   : > { %s2801_s29 = scalar_lea.vmem [#allocation9], %s648_s2 }
 0x180   : > { %1888 = dma.done.wait (%p2279_p6), %s647_s25, 16  }
 0x181   : > { %1890 = vsyncadd (%p2279_p6), %s647_s25, 4294967280  ;;  %s3246_s16 = sld [smem:[#allocation64_spill]] }
 0x187   : > { %s657_s7 = sand.u32 1, %s3246_s16  }
 0x188   : > { %s2808_s22 = scalar_lea.vmem [#allocation11], %s657_s7 }
 0x189   : > { %1892 = dma.done.wait (%p2564_p9), %s647_s25, 16  }
 0x18a   : > { %1894 = vsyncadd (%p2564_p9), %s647_s25, 4294967280  ;;  %s666_s19 = sand.u32 1, %s1985_s12   ;;  %s665_s14 = scalar_lea.sflag [#allocation13], %s646_s1 }
 0x18b   : > { %s2815_s24 = scalar_lea.vmem [#allocation12], %s666_s19  ;;  %p3247_p12 = scmp.ne.s32.totalorder %s3136_s17, 0 }
 0x18d   : > { %1896 = dma.done.wait (%p3247_p12), %s665_s14, 16  }
 0x18e   : > { %1898 = vsyncadd (%p3247_p12), %s665_s14, 4294967280  ;;  %s3248_s28 = sld [smem:[#allocation60_spill]]  ;;  %p3249_p6 = scmp.ne.s32.totalorder %s3198_s6, 0 }
 0x194   : > { %s675_s0 = sand.u32 1, %s3248_s28  }
 0x195   : > { %s2822_s21 = scalar_lea.vmem [#allocation14], %s675_s0 }
 0x196   : > { %1900 = dma.done.wait (%p3249_p6), %s665_s14, 16  }
 0x197   : > { %1902 = vsyncadd (%p3249_p6), %s665_s14, 4294967280  ;;  %s3250_s3 = sld [smem:[#allocation51_spill]]  ;;  %s683_s18 = scalar_lea.sflag [#allocation16], %s646_s1 }
 0x198   : > { %s3251_s13 = sld [smem:[#allocation81_spill]] }
 0x19d   : > { %s684_s9 = sand.u32 1, %s3250_s3  }
 0x19e   : > { %s2829_s15 = scalar_lea.vmem [#allocation15], %s684_s9  ;;  %p3252_p13 = scmp.ne.s32.totalorder %s3251_s13, 0 }
 0x1a0   : > { %1904 = dma.done.wait (%p3252_p13), %s683_s18, 16  }
 0x1a1   : > { %1906 = vsyncadd (%p3252_p13), %s683_s18, 4294967280  ;;  %s3253_s17 = sld [smem:[#allocation58_spill]] }
 0x1a2   : > { %s3254_s20 = sld [smem:[#allocation68_spill]] }
 0x1a7   : > { %s693_s11 = sand.u32 1, %s3253_s17  }
 0x1a8   : > { %s2836_s26 = scalar_lea.vmem [#allocation17], %s693_s11  ;;  %p3255_p9 = scmp.ne.s32.totalorder %s3254_s20, 0 }
 0x1aa   : > { %1908 = dma.done.wait (%p3255_p9), %s683_s18, 16  }
 0x1ab   : > { %1910 = vsyncadd (%p3255_p9), %s683_s18, 4294967280  ;;  %s3256_s6 = sld [smem:[#allocation55_spill]] }
 0x1b1   : > { %s700_s30 = sand.u32 1, %s3256_s6  }
 0x1b2   : > { %s701_s27 = scalar_lea.sflag [#allocation19], %s700_s30  ;;  %s2843_s1 = scalar_lea.vmem [#allocation18], %s700_s30 }
 0x1b3   : > { %1912 = dma.done.wait (%p2752_p0), %s701_s27, 16  }
 0x1b4   : > { %1914 = vsyncadd (%p2752_p0), %s701_s27, 4294967280 }
 0x1b5   : > { %709 = sfence }
 0x1b6   : > { %s3257_s2 = sld [smem:[#allocation52_spill]]  ;;  %v2041_v0 = vmov 0.0   ;;  %v815_v1 = vld [vmem:[%s2793_s8] sm:$0x1] }
 0x1b7   : > { %s3258_s25 = sld [smem:[#allocation71_spill]]  ;;  %v821_v3 = vld [vmem:[%s2801_s29] sm:$0x1] }
 0x1b8   : > { %v827_v5 = vld [vmem:[%s2808_s22] sm:$0x1]  ;;  %s3259_s22 = sld [smem:[#allocation96_spill]] }
 0x1b9   : > { %v833_v8 = vld [vmem:[%s2815_s24] sm:$0x1]  ;;  %s3261_s24 = sld [smem:[#allocation77_spill]] }
 0x1ba   : > { %v839_v14 = vld [vmem:[%s2822_s21] sm:$0x1] }
 0x1bb   : > { %v845_v18 = vld [vmem:[%s2829_s15] sm:$0x1] }
 0x1bc   : > { %s764_s16 = sand.u32 1, %s3257_s2   ;;  %v851_v22 = vld [vmem:[%s2836_s26] sm:$0x1] }
 0x1bd   : > { %s1125_s7 = sshll.u32 %s3258_s25, 3  ;;  %s2853_s14 = scalar_lea.vmem [#allocation20], %s764_s16  ;;  %v857_v26 = vld [vmem:[%s2843_s1] sm:$0x1] }
 0x1be   : > { %s814_s19 = sld [smem:[#allocation4 + %s1125_s7]]  ;;  %809 = vst [vmem:[%s2853_s14] sm:$0x1] %v2041_v0  ;;  %s819_s28 = sadd.s32 1, %s1125_s7 }
 0x1bf   : > { %s825_s0 = sadd.s32 2, %s1125_s7  ;;  %s820_s10 = sld [smem:[#allocation4 + %s819_s28]] }
 0x1c0   : > { %s831_s3 = sadd.s32 3, %s1125_s7  ;;  %s826_s13 = sld [smem:[#allocation4 + %s825_s0]] }
 0x1c1   : > { %s837_s9 = sadd.s32 4, %s1125_s7  ;;  %s832_s18 = sld [smem:[#allocation4 + %s831_s3]] }
 0x1c2   : > { %s843_s17 = sadd.s32 5, %s1125_s7  ;;  %s838_s20 = sld [smem:[#allocation4 + %s837_s9]] }
 0x1c3   : > { %s849_s11 = sadd.s32 6, %s1125_s7  ;;  %s844_s6 = sld [smem:[#allocation4 + %s843_s17]] }
 0x1c4   : > { %v816_v2 = vstv %s814_s19  ;;  %s855_s30 = sadd.s32 7, %s1125_s7  ;;  %s850_s27 = sld [smem:[#allocation4 + %s849_s11]] }
 0x1c5   : > { %v817_v4 = vmul.f32 %v816_v2, %v815_v1  ;;  %v810_v6 = vld [vmem:[%s2853_s14] sm:$0x1]  ;;  %v822_v7 = vstv %s820_s10  ;;  %s856_s28 = sld [smem:[#allocation4 + %s855_s30]]  ;;  %s3260_s3 = smov %s3259_s22 }
 0x1c6   : > { %v823_v10 = vmul.f32 %v822_v7, %v821_v3  ;;  %v828_v11 = vstv %s826_s13  ;;  %s872_s21 = scalar_lea.hbm %s3259_s22, %s3258_s25  ;;  %s874_s15 = sshll.u32 %s2853_s14, 4  ;;  %s875_s15 = int_to_ptr.vmem [resolvable:$true] %s874_s15 }
 0x1c7   : > { %v818_v9 = vadd.f32 %v817_v4, %v810_v6  ;;  %v829_v12 = vmul.f32 %v828_v11, %v827_v5  ;;  %v834_v13 = vstv %s832_s18  ;;  %s876_s7 = sshll.u32 %s872_s21, 4  ;;  %s863_s26 = scalar_lea.sflag [#allocation6], %s764_s16  ;;  %s877_s7 = int_to_ptr.hbm [resolvable:$true] %s876_s7 }
 0x1c8   : > { %v835_v16 = vmul.f32 %v834_v13, %v833_v8  ;;  %v840_v17 = vstv %s838_s20  ;;  %s1743_s1 = sshra.s32 %s877_s7, 4  ;;  %p3262_p2 = scmp.ne.s32.totalorder %s3261_s24, 0  ;;  %s1744_s1 = int_to_ptr.hbm [resolvable:$true] %s1743_s1 }
 0x1c9   : > { %v824_v15 = vadd.f32 %v823_v10, %v818_v9  ;;  %v846_v19 = vstv %s844_s6  ;;  %v841_v21 = vmul.f32 %v840_v17, %v839_v14  ;;  %s1745_s19 = scalar_lea.hbm %s1744_s1, 1  ;;  %s1749_s10 = scalar_lea.hbm %s3260_s3, 2 }
 0x1ca   : > { %v852_v23 = vstv %s850_s27  ;;  %v847_v25 = vmul.f32 %v846_v19, %v845_v18  ;;  %p1746_p0 = scmp.ne.s32.totalorder %s1744_s1, %s1745_s19  ;;  %p1750_p5 = scmp.lt.s32.totalorder %s1744_s1, %s3260_s3 }
 0x1cb   : > { %v830_v20 = vadd.f32 %v829_v12, %v824_v15  ;;  %v858_v27 = vstv %s856_s28  ;;  %v853_v29 = vmul.f32 %v852_v23, %v851_v22  ;;  %p1751_p1 = scmp.lt.s32.totalorder %s1749_s10, %s1745_s19 }
 0x1cc   : > { %v859_v31 = vmul.f32 %v858_v27, %v857_v26  ;;  %p1747_p7 = pnand %p1746_p0, %p3262_p2 }
 0x1cd   : > { %v836_v24 = vadd.f32 %v835_v16, %v830_v20  ;;  %p1752_p11 = por %p1751_p1, %p1750_p5 }
 0x1ce   : > { %p1748_p4 = pneg %p1747_p7 }
 0x1cf   : > { %v842_v28 = vadd.f32 %v841_v21, %v836_v24 }
 0x1d0   : > { %p1753_p3 = pnand %p1752_p11, %p1748_p4 }
 0x1d1   : > { %v848_v30 = vadd.f32 %v847_v25, %v842_v28 }
 0x1d3   : > { %v854_v32 = vadd.f32 %v853_v29, %v848_v30 }
 0x1d5   : > { %v860_v33 = vadd.f32 %v859_v31, %v854_v32 }
 0x1d7   : > { %861 = vst [vmem:[%s2853_s14] sm:$0x1] %v860_v33 }
 0x1d8   : > { %1756 = shalt.err (!%p1753_p3)
}
 0x1d9   : > { %1164 = dma.vmem_to_hbm [thread:$0]  (%p3262_p2), %s875_s15, 16, %s877_s7, %s863_s26  }
 0x1da PF: > { %s3263_s2 = sld [smem:[#allocation48_spill]]  ;;  %p3266_p10 = scmp.ge.s32.totalorder %s2037_s5, 2 }
 0x1db   : > { %s3264_s16 = sld [smem:[#allocation78_spill]] }
 0x1e0   : > { %s888_s14 = sand.u32 1, %s3263_s2  }
 0x1e1   : > { %p3265_p8 = scmp.ne.s32.totalorder %s3264_s16, 0  ;;  %s889_s18 = scalar_lea.sflag [#allocation6], %s888_s14 }
 0x1e3   : > { %p1212_p12 = pnand %p3266_p10, %p3265_p8 }
 0x1e5   : > { %p1213_p6 = pneg %p1212_p12 }
 0x1e7   : > { %1916 = dma.done.wait (%p1213_p6), %s889_s18, 16  }
 0x1e8   : > { %1918 = vsyncadd (%p1213_p6), %s889_s18, 4294967280  ;;  %s3066_s6 = sadd.s32 1, %s2037_s5   ;;  %s3267_s0 = sld [smem:[#allocation52_spill]] }
 0x1e9   : > { %s3268_s17 = sld [smem:[#allocation53_spill]]  ;;  %p2891_p13 = scmp.ge.s32.totalorder %s3066_s6, 4  }
 0x1ea   : > { %s3269_s18 = sld [smem:[#allocation76_spill]]  ;;  %s3288_s21 = smov %s3359_s23 }
 0x1eb   : > { %s3270_s19 = sld [smem:[#allocation55_spill]] }
 0x1ec   : > { %s3271_s20 = sld [smem:[#allocation56_spill]] }
 0x1ed   : > { %s3272_s22 = sld [smem:[#allocation58_spill]] }
 0x1ee   : > { %s3273_s11 = sld [smem:[#allocation49_spill]] }
 0x1ef   : > { %s3274_s24 = sld [smem:[#allocation86_spill]] }
 0x1f0   : > { %s3275_s25 = sld [smem:[#allocation51_spill]] }
 0x1f1   : > { %s3276_s26 = sld [smem:[#allocation50_spill]] }
 0x1f2   : > { %s3277_s27 = sld [smem:[#allocation82_spill]] }
 0x1f3   : > { %s3278_s28 = sld [smem:[#allocation60_spill]] }
 0x1f4   : > { %s3279_s29 = sld [smem:[#allocation61_spill]]  ;;  %s3291_s23 = smov %s3273_s11 }
 0x1f5   : > { %s3280_s30 = sld [smem:[#allocation85_spill]] }
 0x1f6   : > { %s3281_s8 = scalar_select %p2891_p13, 1, 0 }
 0x1f7   : > { %s3283_s15 = sld [smem:[#allocation62_spill]] }
 0x1f8   : > { %3282 = sst [smem:[#allocation51_spill]] %s3281_s8 }
 0x1f9   : > { %s3284_s13 = sld [smem:[#allocation80_spill]] }
 0x1fa   : > { %s3285_s14 = sld [smem:[#allocation64_spill]] }
 0x1fb   : > { %s3286_s7 = sld [smem:[#allocation65_spill]] }
 0x1fc   : > { %s3287_s16 = sld [smem:[#allocation84_spill]] }
 0x1fd   : > { %s3289_s10 = sld [smem:[#allocation66_spill]] }
 0x1fe   : > { %s3290_s9 = sld [smem:[#allocation67_spill]] }
 0x1ff   : > { %s3292_s1 = sld [smem:[#allocation79_spill]] }
 0x200   : > { %s3293_s2 = sld [smem:[#allocation69_spill]] }
 0x201   : > { %s3294_s6 = sld [smem:[#allocation70_spill]] }
 0x202   : > { %s3295_s3 = sld [smem:[#allocation83_spill]] }
 0x203   : > { %s3296_s4 = sld [smem:[#allocation72_spill]] }
 0x204   : > { %s3297_s5 = sld [smem:[#allocation74_spill]] }
 0x205   : > { %s3298_s8 = sld [smem:[#allocation73_spill]] }
 0x206   : > { %3300 = sst [smem:[#allocation48_spill]] %s1985_s12  ;;  %s3301_s12 = smov %s3283_s15 }
 0x207   : > { %s3302_s15 = smov %s3286_s7  ;;  %3303 = sst [smem:[#allocation49_spill]] %s3292_s1 }
 0x208   : > { %3304 = sst [smem:[#allocation50_spill]] %s3293_s2  ;;  %s3306_s2 = smov %s3295_s3 }
 0x209   : > { %3305 = sst [smem:[#allocation51_spill]] %s3294_s6  ;;  %s3307_s7 = smov %s3296_s4 }
 0x20a   : > { %s3308_s1 = smov %s3297_s5  ;;  %46 = sbr.rel (!%p2891_p13) target bundleno = 44 (0x2c), region = 195 }
 0x20b   : > { %s3309_s5 = sadd.s32 1, %s3298_s8  }
 0x20f   :  { %894 = vsyncpa [#allocation5], 1 }
 0x210   :  { %896 = vsyncpa [#allocation5 + $0x1], 1 }
 0x211   :  { %897 = vsyncpa [#allocation10], 1 }
 0x212   :  { %899 = vsyncpa [#allocation10 + $0x1], 1 }
 0x213   :  { %900 = vsyncpa [#allocation13], 1 }
 0x214   :  { %902 = vsyncpa [#allocation13 + $0x1], 1 }
 0x215   :  { %903 = vsyncpa [#allocation16], 1 }
 0x216   :  { %905 = vsyncpa [#allocation16 + $0x1], 1 }
 0x217   :  { %906 = vsyncpa [#allocation19], 1 }
 0x218   :  { %908 = vsyncpa [#allocation19 + $0x1], 1 }
 0x219   :  { %909 = vsyncpa [#allocation6], 1 }
 0x21a   :  { %911 = vsyncpa [#allocation6 + $0x1], 1 }
 0x21b   :  { %912 = vsyncpa [#allocation7], 1 }
 0x21c   :  { %914 = vsyncpa [#allocation7 + $0x1], 1 }

</bundles_post_ra>
